<compile_context>
chip_gen: v6e
topology: v6e:2x2x1
jax: 0.10.0
libtpu: 0.0.40
codegen_flags: <defaults>
</compile_context>

<pallas_src>
import functools
import math

import jax
import jax.numpy as jnp
from jax.experimental import pallas as pl
from jax.experimental.pallas import tpu as pltpu

_LANE = 128           # lane (fast) axis width
_TARGET_BLOCK_ROWS = 2048   # ~1 MiB f32 per input tile -> 4 MiB double-buffered


def _l1_loss_kernel(gt_ref, pred_ref, out_ref, acc_ref, *, scale):
    """One grid step: accumulate sum(|gt - pred|) over a (block_rows, 128) tile."""
    i = pl.program_id(0)

    @pl.when(i == 0)
    def _():
        acc_ref[...] = jnp.zeros_like(acc_ref)

    gt = gt_ref[...].astype(jnp.float32)
    pr = pred_ref[...].astype(jnp.float32)
    acc_ref[...] += jnp.sum(jnp.abs(gt - pr))

    @pl.when(i == pl.num_programs(0) - 1)
    def _():
        out_ref[...] = acc_ref[...] * scale


def l1_loss(ground_truth, predict, weight=1.0):
    """Pallas implementation of L1Loss.forward(ground_truth, predict). Returns a scalar."""
    assert ground_truth.shape == predict.shape, "inputs must have identical shapes"
    total = int(math.prod(ground_truth.shape))
    assert total > 0, "inputs must be non-empty"

    # Lane-dense 2D layout: (rows, 128). Pad rows to a sublane multiple (8) and
    # to a multiple of the row-tile so the (8,128) block constraint holds.
    rows = -(-total // _LANE)
    rows = ((rows + 7) // 8) * 8
    block_rows = min(_TARGET_BLOCK_ROWS, rows)
    rows = ((rows + block_rows - 1) // block_rows) * block_rows
    padded_total = rows * _LANE

    gt_flat = ground_truth.reshape(-1)
    pr_flat = predict.reshape(-1)
    if padded_total != total:
        # Zero padding contributes 0 to sum(|gt - pred|); we divide by the true count.
        pad = padded_total - total
        gt_flat = jnp.pad(gt_flat, (0, pad))
        pr_flat = jnp.pad(pr_flat, (0, pad))
    gt2 = gt_flat.reshape(rows, _LANE)
    pr2 = pr_flat.reshape(rows, _LANE)

    grid = (rows // block_rows,)
    # TODO(synk): `weight` is baked in as a static float; changing it retraces.
    scale = float(weight) / float(total)
    kernel = functools.partial(_l1_loss_kernel, scale=scale)

    tile_bytes = block_rows * _LANE * gt2.dtype.itemsize
    # 2 inputs x 2 pipeline buffers + headroom, clamped well under physical VMEM.
    vmem_bytes = min(96 * 1024 * 1024, 2 * 2 * tile_bytes + (2 << 20))

    out = pl.pallas_call(
        kernel,
        out_shape=jax.ShapeDtypeStruct((1, 1), jnp.float32),
        grid_spec=pltpu.PrefetchScalarGridSpec(
            num_scalar_prefetch=0,
            grid=grid,
            in_specs=[
                pl.BlockSpec((block_rows, _LANE), lambda i: (i, 0)),
                pl.BlockSpec((block_rows, _LANE), lambda i: (i, 0)),
            ],
            out_specs=pl.BlockSpec((1, 1), lambda i: (0, 0)),
            scratch_shapes=[pltpu.VMEM((1, 1), jnp.float32)],
        ),
        compiler_params=pltpu.CompilerParams(
            dimension_semantics=("arbitrary",),   # reduction axis (accumulator)
            vmem_limit_bytes=int(vmem_bytes),
        ),
    )(gt2, pr2)
    return out[0, 0]


def _l1_loss_ref(ground_truth, predict, weight=1.0):
    """Pure-JAX reference matching the PyTorch module."""
    diff = ground_truth.astype(jnp.float32) - predict.astype(jnp.float32)
    return weight * jnp.mean(jnp.abs(diff))


if __name__ == "__main__":
    key = jax.random.PRNGKey(0)

    # Case 1: shapes implied by the module usage (NCHW images), total divides cleanly.
    k1, k2, k3, k4 = jax.random.split(key, 4)
    gt_a = jax.random.uniform(k1, (2, 4, 16, 16), dtype=jnp.float32)
    pr_a = jax.random.uniform(k2, (2, 4, 16, 16), dtype=jnp.float32)
    loss_a = jax.block_until_ready(l1_loss(gt_a, pr_a, weight=1.0))
    ref_a = jax.block_until_ready(_l1_loss_ref(gt_a, pr_a, weight=1.0))
    assert jnp.allclose(loss_a, ref_a, rtol=1e-5, atol=1e-6), (loss_a, ref_a)

    # Case 2: odd shape (exercises the zero-padding path) and a non-unit weight.
    gt_b = jax.random.uniform(k3, (2, 3, 17, 19), dtype=jnp.float32)
    pr_b = jax.random.uniform(k4, (2, 3, 17, 19), dtype=jnp.float32)
    loss_b = jax.block_until_ready(l1_loss(gt_b, pr_b, weight=0.5))
    ref_b = jax.block_until_ready(_l1_loss_ref(gt_b, pr_b, weight=0.5))
    assert jnp.allclose(loss_b, ref_b, rtol=1e-5, atol=1e-6), (loss_b, ref_b)

    print("KERNEL_OK")
</pallas_src>

<mosaic_0001>
module attributes {stable_mosaic.version = 11 : i64} {
  func.func @_l1_loss_kernel(%arg0: i32, %arg1: memref<16x128xf32, #tpu.memory_space<vmem>>, %arg2: memref<16x128xf32, #tpu.memory_space<vmem>>, %arg3: memref<1x1xf32, #tpu.memory_space<vmem>>, %arg4: memref<1x1xf32, #tpu.memory_space<vmem>>) attributes {dimension_semantics = [#tpu.dimension_semantics<arbitrary>], iteration_bounds = array<i64: 1>, scalar_prefetch = 0 : i64, scratch_operands = 1 : i64, tpu.core_type = #tpu.core_type<tc>, window_params = [{transform_indices = @transform_0, window_bounds = array<i64: 16, 128>}, {transform_indices = @transform_1, window_bounds = array<i64: 16, 128>}, {pipeline_mode = #tpu.pipeline_mode<synchronous>, transform_indices = @transform_2, window_bounds = array<i64: 1, 1>}]} {
    %c0_i32 = arith.constant 0 : i32
    %0 = arith.cmpi eq, %arg0, %c0_i32 : i32
    %1 = arith.extui %0 : i1 to i32
    %c0_i32_0 = arith.constant 0 : i32
    %2 = arith.cmpi ne, %1, %c0_i32_0 : i32
    scf.if %2 {
      %cst_10 = arith.constant 0.000000e+00 : f32
      %18 = vector.broadcast %cst_10 : f32 to vector<1x1xf32>
      %c0_11 = arith.constant 0 : index
      %c0_12 = arith.constant 0 : index
      %19 = vector.load %arg4[%c0_11, %c0_12] : memref<1x1xf32, #tpu.memory_space<vmem>>, vector<1x1xf32>
      tpu.vector_store %arg4[%c0_11, %c0_12], %18 {strides = array<i32>} : memref<1x1xf32, #tpu.memory_space<vmem>>, vector<1x1xf32>,
    } else {
    }
    %c0 = arith.constant 0 : index
    %c0_1 = arith.constant 0 : index
    %3 = vector.load %arg1[%c0, %c0_1] : memref<16x128xf32, #tpu.memory_space<vmem>>, vector<16x128xf32>
    %c0_2 = arith.constant 0 : index
    %c0_3 = arith.constant 0 : index
    %4 = vector.load %arg2[%c0_2, %c0_3] : memref<16x128xf32, #tpu.memory_space<vmem>>, vector<16x128xf32>
    %c0_4 = arith.constant 0 : index
    %c0_5 = arith.constant 0 : index
    %5 = vector.load %arg4[%c0_4, %c0_5] : memref<1x1xf32, #tpu.memory_space<vmem>>, vector<1x1xf32>
    %6 = arith.subf %3, %4 : vector<16x128xf32>
    %7 = math.absf %6 : vector<16x128xf32>
    %8 = vector.shape_cast %7 : vector<16x128xf32> to vector<1x16x128xf32>
    %cst = arith.constant dense<0.000000e+00> : vector<1xf32>
    %9 = vector.multi_reduction <add>, %8, %cst [1, 2] : vector<1x16x128xf32> to vector<1xf32>
    %10 = vector.shape_cast %9 : vector<1xf32> to vector<1x1x1xf32>
    %11 = vector.extract %10[0, 0, 0] : f32 from vector<1x1x1xf32>
    %12 = vector.broadcast %11 : f32 to vector<1x1xf32>
    %13 = arith.addf %5, %12 : vector<1x1xf32>
    %c0_6 = arith.constant 0 : index
    %c0_7 = arith.constant 0 : index
    %14 = vector.load %arg4[%c0_6, %c0_7] : memref<1x1xf32, #tpu.memory_space<vmem>>, vector<1x1xf32>
    tpu.vector_store %arg4[%c0_6, %c0_7], %13 {strides = array<i32>} : memref<1x1xf32, #tpu.memory_space<vmem>>, vector<1x1xf32>,
    %c0_i32_8 = arith.constant 0 : i32
    %15 = arith.cmpi eq, %arg0, %c0_i32_8 : i32
    %16 = arith.extui %15 : i1 to i32
    %c0_i32_9 = arith.constant 0 : i32
    %17 = arith.cmpi ne, %16, %c0_i32_9 : i32
    scf.if %17 {
      %c0_10 = arith.constant 0 : index
      %c0_11 = arith.constant 0 : index
      %18 = vector.load %arg4[%c0_10, %c0_11] : memref<1x1xf32, #tpu.memory_space<vmem>>, vector<1x1xf32>
      %cst_12 = arith.constant 4.8828125E-4 : f32
      %19 = vector.broadcast %cst_12 : f32 to vector<1x1xf32>
      %20 = arith.mulf %18, %19 : vector<1x1xf32>
      %c0_13 = arith.constant 0 : index
      %c0_14 = arith.constant 0 : index
      %21 = vector.load %arg3[%c0_13, %c0_14] : memref<1x1xf32, #tpu.memory_space<vmem>>, vector<1x1xf32>
      tpu.vector_store %arg3[%c0_13, %c0_14], %20 {strides = array<i32>} : memref<1x1xf32, #tpu.memory_space<vmem>>, vector<1x1xf32>,
    } else {
    }
    return
  }
  func.func @transform_0(%arg0: i32) -> (i32, i32) {
    %c0_i32 = arith.constant 0 : i32
    %c0_i32_0 = arith.constant 0 : i32
    return %arg0, %c0_i32 : i32, i32
  }
  func.func @transform_1(%arg0: i32) -> (i32, i32) {
    %c0_i32 = arith.constant 0 : i32
    %c0_i32_0 = arith.constant 0 : i32
    return %arg0, %c0_i32 : i32, i32
  }
  func.func @transform_2(%arg0: i32) -> (i32, i32) {
    %c0_i32 = arith.constant 0 : i32
    %c0_i32_0 = arith.constant 0 : i32
    %c0_i32_1 = arith.constant 0 : i32
    return %c0_i32, %c0_i32_0 : i32, i32
  }
}

</mosaic_0001>

<bundles_post_ra>
// kernel: tpu_custom_call.1
= control target key start
LH: loop header
LB: loop body
LE: loop exit
PB: predicated region body
PF: predicated region fallthrough
CT: control target
= control target key end

     0   :  { %7 = vsyncpa [#allocation4], 0  ;;  %s198_s0 = inlined_call_operand.hbm [shape: f32[16,128], index: 0, kind: input, shape index: {}]   ;;  %s199_s1 = inlined_call_operand.hbm [shape: f32[16,128], index: 1, kind: input, shape index: {}]   ;;  %s200_s2 = inlined_call_operand.hbm [shape: f32[1,1], index: 2, kind: output, shape index: {}]  }
   0x1   :  { %8 = vsyncpa [#allocation7], 0 }
   0x2   :  { %9 = vsyncpa [#allocation5], 0  ;;  %s165_s9 = smov [#allocation3]  }
   0x3   :  { %s15_s10 = sshll.u32 %s165_s9, 4  ;;  %s16_s10 = int_to_ptr.vmem [resolvable:$true] %s15_s10 }
   0x4   :  { %s107_s11 = scalar_lea.vmem %s16_s10, 256  ;;  %p112_p1 = scmp.lt.s32.totalorder %s16_s10, %s16_s10 }
   0x5   :  { %p108_p0 = scmp.ne.s32.totalorder %s16_s10, %s107_s11  ;;  %p113_p2 = scmp.lt.s32.totalorder %s107_s11, %s107_s11 }
   0x7   :  { %p114_p3 = por %p113_p2, %p112_p1 }
   0x9   :  { %p115_p4 = pnand %p114_p3, %p108_p0 }
   0xb   :  { %118 = shalt.err (!%p115_p4)
}
   0xc   :  { %s166_s12 = smov 128   ;;  %s167_s13 = smov 8  }
   0xd   :  { %21 = dma.hbm_to_vmem [thread:$0]  %s198_s0, 256, %s16_s10, [#allocation4], %s166_s12, %s166_s12, %s167_s13  }
   0xe   :  { %s168_s16 = smov [#allocation6]  }
   0xf   :  { %s27_s17 = sshll.u32 %s168_s16, 4  ;;  %s28_s17 = int_to_ptr.vmem [resolvable:$true] %s27_s17 }
  0x10   :  { %s127_s18 = scalar_lea.vmem %s28_s17, 256  ;;  %p132_p6 = scmp.lt.s32.totalorder %s28_s17, %s28_s17 }
  0x11   :  { %p128_p5 = scmp.ne.s32.totalorder %s28_s17, %s127_s18  ;;  %p133_p7 = scmp.lt.s32.totalorder %s127_s18, %s127_s18 }
  0x13   :  { %p134_p8 = por %p133_p7, %p132_p6 }
  0x15   :  { %p135_p9 = pnand %p134_p8, %p128_p5 }
  0x17   :  { %138 = shalt.err (!%p135_p9)
}
  0x18   :  { %33 = dma.hbm_to_vmem [thread:$0]  %s199_s1, 256, %s28_s17, [#allocation7], %s166_s12, %s166_s12, %s167_s13  }
  0x19   :  { %159 = dma.done.wait [#allocation4], 256  }
  0x1a   :  { %160 = vsyncadd [#allocation4], 4294967040 }
  0x1b   :  { %161 = dma.done.wait [#allocation7], 256  }
  0x1c   :  { %162 = vsyncadd [#allocation7], 4294967040  ;;  %v46_v0 = vld [vmem:[#allocation3] sm:$0xff]  ;;  %v47_v1 = vld [vmem:[#allocation3 + $0x8] sm:$0xff]  ;;  %vm44_vm0 = vcmask 0   ;;  %v169_v9 = vmov 0.0  }
  0x1d   :  { %v48_v2 = vld [vmem:[#allocation6] sm:$0xff]  ;;  %v49_v3 = vld [vmem:[#allocation6 + $0x8] sm:$0xff]  ;;  %45 = vst.msk [vmem:[#allocation2] sm:$0x1] %vm44_vm0, %v169_v9  ;;  %s170_s1 = smov [#allocation8]  }
  0x1e   :  { %v51_v4 = vsub.f32 %v46_v0, %v48_v2  ;;  %v52_v5 = vsub.f32 %v47_v1, %v49_v3  ;;  %s81_s21 = sshll.u32 %s170_s1, 4  ;;  %s82_s21 = int_to_ptr.vmem [resolvable:$true] %s81_s21 }
  0x1f   :  { %s139_s22 = scalar_lea.vmem %s82_s21, 16  ;;  %s143_s23 = scalar_lea.vmem %s82_s21, 32 }
  0x20   :  { %v53_v6 = vand.u32 2147483647, %v51_v4  ;;  %v54_v7 = vand.u32 2147483647, %v52_v5  ;;  %p140_p10 = scmp.ne.s32.totalorder %s82_s21, %s139_s22  ;;  %p144_p11 = scmp.lt.s32.totalorder %s82_s21, %s82_s21 }
  0x21   :  { %p145_p12 = scmp.lt.s32.totalorder %s143_s23, %s139_s22 }
  0x22   :  { %v55_v8 = vadd.f32 %v54_v7, %v53_v6 }
  0x23   :  { %p146_p13 = por %p145_p12, %p144_p11 }
  0x24   :  { %56 = vadd.xlane.f32.xlu0 %v55_v8  ;;  %v50_v17 = vld [vmem:[#allocation2] sm:$0x1] }
  0x25   :  { %p147_p0 = pnand %p146_p13, %p140_p10 }
  0xad   :  { %v57_v10 = vpop.xlane.xlu0 %56 }
  0xae   :  { %v58_v11 = vrot.slane %v57_v10, 4 }
  0xb0   :  { %v59_v12 = vadd.f32 %v58_v11, %v57_v10 }
  0xb2   :  { %v60_v13 = vrot.slane %v59_v12, 2 }
  0xb4   :  { %v61_v14 = vadd.f32 %v60_v13, %v59_v12 }
  0xb6   :  { %v62_v15 = vrot.slane %v61_v14, 1 }
  0xb8   :  { %v63_v16 = vadd.f32 %v62_v15, %v61_v14 }
  0xba   :  { %91 = vpush %v63_v16 }
  0xeb   :  { %s92_s0 = spop %91 }
  0xec   :  { %v65_v18 = vstv %s92_s0 }
  0xed   :  { %v66_v19 = vadd.f32 %v65_v18, %v50_v17 }
  0xef   :  { %68 = vst.msk [vmem:[#allocation2] sm:$0x1] %vm44_vm0, %v66_v19 }
  0xf6   :  { %v72_v20 = vld [vmem:[#allocation2] sm:$0x1] }
  0xf7   :  { %v73_v21 = vmul.f32 0.00048828125, %v72_v20 }
  0xf9   :  { %74 = vst.msk [vmem:[#allocation8] sm:$0x1] %vm44_vm0, %v73_v21 }
  0xfa   :  { %150 = shalt.err (!%p147_p0)
}
  0xfb   :  { %84 = dma.vmem_to_hbm [thread:$0]  %s82_s21, 16, %s200_s2, [#allocation5]  }
  0xfc   :  { %163 = dma.done.wait [#allocation5], 16  }
  0xfd   :  { %164 = vsyncadd [#allocation5], 4294967280 }
  0xfe   :  { %88 = vsyncpa [#allocation4], 1 }
  0xff   :  { %89 = vsyncpa [#allocation7], 1 }
 0x100   :  { %90 = vsyncpa [#allocation5], 1 }

</bundles_post_ra>
